<compile_context>
chip_gen: v7x
topology: tpu7x:2x2x1
jax: 0.10.0
libtpu: 0.0.40
codegen_flags: <defaults>
</compile_context>

<pallas_src>
import jax
import jax.numpy as jnp
from jax.experimental import pallas as pl
from jax.experimental.pallas import tpu as pltpu


LN_EPS = 1e-5
_VMEM_LIMIT_BYTES = 48 * 1024 * 1024   # > all default scoped limits, < v7x 64 MiB physical
_VMEM_TILE_BUDGET = 24 * 1024 * 1024   # budget for double-buffered tiles + resident weights
_TARGET_ROWS = 1024                    # ~512-1024 rows/step: mem-bound DMA sweet spot

_COMPILER_PARAMS = pltpu.CompilerParams(
    dimension_semantics=("parallel",),
    vmem_limit_bytes=_VMEM_LIMIT_BYTES,
)


# --------------------------------------------------------------------------- #
# Kernels
# --------------------------------------------------------------------------- #
def _merged_ln_matmul_kernel(e_ref, o_ref, we_ref, wo_ref, b_ref, out_ref):
    """Fused 2x2-merge + LayerNorm + reduction.

    e_ref / o_ref : (tq, 1, Wo, 2C)  even-/odd-image-row halves of the windows
                    (channel order [x0|x2] and [x1|x3] respectively).
    we_ref/wo_ref : (2C, N) gamma-folded, permuted halves of the Linear weight.
    b_ref         : (1, N)  beta @ W (f32).
    out_ref       : (tq*Wo, N)
    """
    tq, _, wo, c2 = e_ref.shape
    rows = tq * wo
    # Wo % 8 == 0 is guaranteed by the wrapper, so collapsing (tq, 1, Wo) into
    # the sublane axis is a layout-preserving (free) reshape.
    e = e_ref[...].reshape(rows, c2).astype(jnp.float32)
    o = o_ref[...].reshape(rows, c2).astype(jnp.float32)

    inv_n = 1.0 / (2.0 * c2)  # 1 / (4C)
    # Single-pass LayerNorm stats over the virtual 4C row: E[x], E[x^2].
    s1 = jnp.sum(e, axis=-1, keepdims=True) + jnp.sum(o, axis=-1, keepdims=True)
    s2 = jnp.sum(e * e, axis=-1, keepdims=True) + jnp.sum(o * o, axis=-1, keepdims=True)
    mean = s1 * inv_n
    var = s2 * inv_n - mean * mean
    inv = jax.lax.rsqrt(var + LN_EPS)

    en = ((e - mean) * inv).astype(we_ref.dtype)
    on = ((o - mean) * inv).astype(wo_ref.dtype)
    acc = jnp.dot(en, we_ref[...], preferred_element_type=jnp.float32)
    acc = acc + jnp.dot(on, wo_ref[...], preferred_element_type=jnp.float32)
    out_ref[...] = (acc + b_ref[...]).astype(out_ref.dtype)


def _rows_ln_matmul_kernel(x_ref, w_ref, b_ref, out_ref):
    """Fallback: LayerNorm + reduction on pre-merged (tm, 4C) rows."""
    x = x_ref[...].astype(jnp.float32)
    inv_n = 1.0 / x_ref.shape[-1]
    mean = jnp.sum(x, axis=-1, keepdims=True) * inv_n
    var = jnp.sum(x * x, axis=-1, keepdims=True) * inv_n - mean * mean
    inv = jax.lax.rsqrt(var + LN_EPS)
    xn = ((x - mean) * inv).astype(w_ref.dtype)
    acc = jnp.dot(xn, w_ref[...], preferred_element_type=jnp.float32)
    out_ref[...] = (acc + b_ref[...]).astype(out_ref.dtype)


# --------------------------------------------------------------------------- #
# Tiling helper
# --------------------------------------------------------------------------- #
def _pick_units(total_units, rows_per_unit, unit_bytes, fixed_bytes):
    """Row-units per grid step: VMEM-budgeted, DMA-efficient, >=2 grid steps."""
    avail = max(_VMEM_TILE_BUDGET - fixed_bytes, unit_bytes)
    n = max(1, avail // max(unit_bytes, 1))
    n = min(n, max(1, _TARGET_ROWS // max(rows_per_unit, 1)))
    if total_units >= 2:
        # Keep at least 2 grid steps: pipelining + megacore sharding on v7x.
        n = min(n, -(-total_units // 2))
    return int(max(1, min(n, total_units)))


# --------------------------------------------------------------------------- #
# Wrapper
# --------------------------------------------------------------------------- #
def patch_merging_forward(x, H, W, gamma, beta, w_reduction, *, mxu_dtype=None):
    """Swin PatchMerging forward.

    x           : (B, H*W, C) tokens (channel last, same as the PyTorch module)
    gamma, beta : (4C,) LayerNorm affine parameters
    w_reduction : (2C, 4C) nn.Linear weight (out_features, in_features), no bias
    Returns (y, Ho, Wo) with y: (B, Ho*Wo, 2C) in x's dtype.
    """
    B, L, C = x.shape
    assert L == H * W, "input feature has wrong size"
    if mxu_dtype is None:
        mxu_dtype = jnp.bfloat16 if x.dtype == jnp.bfloat16 else jnp.float32

    xi = x.reshape(B, H, W, C)
    pad_h, pad_w = H % 2, W % 2
    if pad_h or pad_w:  # zero-pad odd spatial dims (matches F.pad in the module)
        xi = jnp.pad(xi, ((0, 0), (0, pad_h), (0, pad_w), (0, 0)))
    Hp, Wp = H + pad_h, W + pad_w
    Ho, Wo = Hp // 2, Wp // 2
    C2, C4 = 2 * C, 4 * C
    M = B * Ho * Wo

    # Fold the LayerNorm affine into the reduction weight / bias (tiny, per call):
    #   y = xn @ (gamma[:,None] * W^T) + beta @ W^T
    wf = w_reduction.T.astype(jnp.float32)            # (4C, 2C)
    wg = gamma.astype(jnp.float32)[:, None] * wf      # (4C, 2C)
    bias = beta.astype(jnp.float32) @ wf               # (2C,)

    # Lane-dense output: pad the output feature dim up to a multiple of 128.
    n_out = max(128, -(-C2 // 128) * 128)
    if n_out != C2:
        wg = jnp.pad(wg, ((0, 0), (0, n_out - C2)))
        bias = jnp.pad(bias, (0, n_out - C2))
    bias = bias.reshape(1, n_out)

    in_it = x.dtype.itemsize
    out_it = x.dtype.itemsize
    w_it = 2 if mxu_dtype == jnp.bfloat16 else 4

    if Wo % 8 == 0:
        # ---------------- fused-gather fast path ----------------
        # Free view of (B, Hp, Wp, C): index (q=b*Ho+ho, p=h-parity, wo, k) where
        # k in [0, 2C) spans the two w-parities.  So the even slab row is
        # [x0 | x2] and the odd slab row is [x1 | x3] of the 2x2 window.
        xr = xi.reshape(B * Ho, 2, Wo, C2)
        # Permute + split the folded weight to match that channel order.
        w_even = jnp.concatenate([wg[0:C], wg[2 * C:3 * C]], axis=0).astype(mxu_dtype)
        w_odd = jnp.concatenate([wg[C:2 * C], wg[3 * C:4 * C]], axis=0).astype(mxu_dtype)

        Q = B * Ho
        unit_bytes = (2 * 2 * Wo * C2 * in_it      # e + o input tiles, double-buffered
                      + 2 * Wo * n_out * out_it)   # output tile, double-buffered
        fixed_bytes = 2 * 2 * C2 * n_out * w_it + 2 * n_out * 4   # weights + bias
        tq = _pick_units(Q, Wo, unit_bytes, fixed_bytes)
        grid = (pl.cdiv(Q, tq),)

        out = pl.pallas_call(
            _merged_ln_matmul_kernel,
            out_shape=jax.ShapeDtypeStruct((M, n_out), x.dtype),
            grid_spec=pltpu.PrefetchScalarGridSpec(
                num_scalar_prefetch=0,
                grid=grid,
                in_specs=[
                    # even image rows of the 2x2 windows
                    pl.BlockSpec((tq, 1, Wo, C2), lambda i: (i, 0, 0, 0)),
                    # odd image rows of the 2x2 windows
                    pl.BlockSpec((tq, 1, Wo, C2), lambda i: (i, 1, 0, 0)),
                    # constant weight/bias blocks (could be single-buffered via
                    # pipeline_mode=pl.Buffered(1) on VMEM-tight generations)
                    pl.BlockSpec((C2, n_out), lambda i: (0, 0)),
                    pl.BlockSpec((C2, n_out), lambda i: (0, 0)),
                    pl.BlockSpec((1, n_out), lambda i: (0, 0)),
                ],
                out_specs=pl.BlockSpec((tq * Wo, n_out), lambda i: (i, 0)),
            ),
            compiler_params=_COMPILER_PARAMS,
        )(xr, xr, w_even, w_odd, bias)
    else:
        # ---------------- fallback: pre-merge rows with XLA ----------------
        x0 = xi[:, 0::2, 0::2, :]
        x1 = xi[:, 1::2, 0::2, :]
        x2 = xi[:, 0::2, 1::2, :]
        x3 = xi[:, 1::2, 1::2, :]
        xm = jnp.concatenate([x0, x1, x2, x3], axis=-1).reshape(M, C4)
        wg_c = wg.astype(mxu_dtype)

        unit_bytes = 8 * (2 * C4 * in_it + 2 * n_out * out_it)
        fixed_bytes = 2 * C4 * n_out * w_it + 2 * n_out * 4
        tm = 8 * _pick_units(pl.cdiv(M, 8), 8, unit_bytes, fixed_bytes)
        grid = (pl.cdiv(M, tm),)

        out = pl.pallas_call(
            _rows_ln_matmul_kernel,
            out_shape=jax.ShapeDtypeStruct((M, n_out), x.dtype),
            grid_spec=pltpu.PrefetchScalarGridSpec(
                num_scalar_prefetch=0,
                grid=grid,
                in_specs=[
                    pl.BlockSpec((tm, C4), lambda i: (i, 0)),
                    pl.BlockSpec((C4, n_out), lambda i: (0, 0)),
                    pl.BlockSpec((1, n_out), lambda i: (0, 0)),
                ],
                out_specs=pl.BlockSpec((tm, n_out), lambda i: (i, 0)),
            ),
            compiler_params=_COMPILER_PARAMS,
        )(xm, wg_c, bias)

    y = out[:, :C2] if n_out != C2 else out
    y = y.reshape(B, Ho * Wo, C2)
    return y, Ho, Wo


# --------------------------------------------------------------------------- #
# Pure-JAX reference (mirrors the PyTorch module, f32)
# --------------------------------------------------------------------------- #
def _reference_forward(x, H, W, gamma, beta, w_reduction):
    B, L, C = x.shape
    xr = x.astype(jnp.float32).reshape(B, H, W, C)
    pad_h, pad_w = H % 2, W % 2
    if pad_h or pad_w:
        xr = jnp.pad(xr, ((0, 0), (0, pad_h), (0, pad_w), (0, 0)))
    x0 = xr[:, 0::2, 0::2, :]
    x1 = xr[:, 1::2, 0::2, :]
    x2 = xr[:, 0::2, 1::2, :]
    x3 = xr[:, 1::2, 1::2, :]
    xm = jnp.concatenate([x0, x1, x2, x3], axis=-1).reshape(B, -1, 4 * C)
    mean = jnp.mean(xm, axis=-1, keepdims=True)
    var = jnp.mean((xm - mean) ** 2, axis=-1, keepdims=True)
    xn = (xm - mean) * jax.lax.rsqrt(var + LN_EPS)
    xn = xn * gamma.astype(jnp.float32) + beta.astype(jnp.float32)
    return xn @ w_reduction.T.astype(jnp.float32)


if __name__ == "__main__":
    key = jax.random.PRNGKey(0)
    k_x, k_g, k_b, k_w, k_x2, k_w2 = jax.random.split(key, 6)

    fwd = jax.jit(patch_merging_forward, static_argnums=(1, 2))

    # --- test 1: even spatial dims -> fused-gather fast path, f32 ---
    B, H, W, dim = 2, 16, 16, 32           # 4C = 128, 2C = 64
    x = jax.random.normal(k_x, (B, H * W, dim), dtype=jnp.float32)
    gamma = 1.0 + 0.02 * jax.random.normal(k_g, (4 * dim,), dtype=jnp.float32)
    beta = 0.02 * jax.random.normal(k_b, (4 * dim,), dtype=jnp.float32)
    w_red = 0.05 * jax.random.normal(k_w, (2 * dim, 4 * dim), dtype=jnp.float32)

    y, Ho, Wo = fwd(x, H, W, gamma, beta, w_red)
    y = jax.block_until_ready(y)
    assert y.shape == (B, (H // 2) * (W // 2), 2 * dim), y.shape
    assert (int(Ho), int(Wo)) == (H // 2, W // 2)
    y_ref = _reference_forward(x, H, W, gamma, beta, w_red)
    err = float(jnp.max(jnp.abs(y - y_ref)))
    assert jnp.allclose(y, y_ref, atol=1e-4, rtol=1e-4), err

    # --- test 2: odd spatial dims -> zero-pad + fallback path, f32 ---
    H2, W2, dim2 = 7, 10, 16
    x2 = jax.random.normal(k_x2, (B, H2 * W2, dim2), dtype=jnp.float32)
    g2 = 1.0 + 0.02 * jax.random.normal(k_g, (4 * dim2,), dtype=jnp.float32)
    b2 = 0.02 * jax.random.normal(k_b, (4 * dim2,), dtype=jnp.float32)
    w2 = 0.05 * jax.random.normal(k_w2, (2 * dim2, 4 * dim2), dtype=jnp.float32)
    y2, Ho2, Wo2 = fwd(x2, H2, W2, g2, b2, w2)
    y2 = jax.block_until_ready(y2)
    assert y2.shape == (B, ((H2 + 1) // 2) * ((W2 + 1) // 2), 2 * dim2), y2.shape
    assert (int(Ho2), int(Wo2)) == ((H2 + 1) // 2, (W2 + 1) // 2)
    y2_ref = _reference_forward(x2, H2, W2, g2, b2, w2)
    assert jnp.allclose(y2, y2_ref, atol=1e-4, rtol=1e-4)

    # --- test 3: bf16 activations -> bf16 MXU path (v6e/v7x), loose tolerance ---
    xb = x.astype(jnp.bfloat16)
    yb, _, _ = fwd(xb, H, W, gamma, beta, w_red)
    yb = jax.block_until_ready(yb)
    assert yb.dtype == jnp.bfloat16
    assert jnp.allclose(yb.astype(jnp.float32), y_ref, atol=5e-2, rtol=5e-2)

    print("KERNEL_OK")
</pallas_src>

<mosaic_0001>
module attributes {stable_mosaic.version = 11 : i64} {
  func.func @_merged_ln_matmul_kernel(%arg0: i32, %arg1: memref<8x1x8x64xf32, #tpu.memory_space<vmem>>, %arg2: memref<8x1x8x64xf32, #tpu.memory_space<vmem>>, %arg3: memref<64x128xf32, #tpu.memory_space<vmem>>, %arg4: memref<64x128xf32, #tpu.memory_space<vmem>>, %arg5: memref<1x128xf32, #tpu.memory_space<vmem>>, %arg6: memref<64x128xf32, #tpu.memory_space<vmem>>) attributes {dimension_semantics = [#tpu.dimension_semantics<parallel>], iteration_bounds = array<i64: 2>, scalar_prefetch = 0 : i64, scratch_operands = 0 : i64, tpu.core_type = #tpu.core_type<tc>, window_params = [{transform_indices = @transform_0, window_bounds = array<i64: 8, 1, 8, 64>}, {transform_indices = @transform_1, window_bounds = array<i64: 8, 1, 8, 64>}, {pipeline_mode = #tpu.pipeline_mode<synchronous>, transform_indices = @transform_2, window_bounds = array<i64: 64, 128>}, {pipeline_mode = #tpu.pipeline_mode<synchronous>, transform_indices = @transform_3, window_bounds = array<i64: 64, 128>}, {pipeline_mode = #tpu.pipeline_mode<synchronous>, transform_indices = @transform_4, window_bounds = array<i64: 1, 128>}, {transform_indices = @transform_5, window_bounds = array<i64: 64, 128>}]} {
    %c0 = arith.constant 0 : index
    %c0_0 = arith.constant 0 : index
    %c0_1 = arith.constant 0 : index
    %c0_2 = arith.constant 0 : index
    %0 = vector.load %arg1[%c0, %c0_0, %c0_1, %c0_2] : memref<8x1x8x64xf32, #tpu.memory_space<vmem>>, vector<8x1x8x64xf32>
    %1 = vector.shape_cast %0 : vector<8x1x8x64xf32> to vector<64x64xf32>
    %c0_3 = arith.constant 0 : index
    %c0_4 = arith.constant 0 : index
    %c0_5 = arith.constant 0 : index
    %c0_6 = arith.constant 0 : index
    %2 = vector.load %arg2[%c0_3, %c0_4, %c0_5, %c0_6] : memref<8x1x8x64xf32, #tpu.memory_space<vmem>>, vector<8x1x8x64xf32>
    %3 = vector.shape_cast %2 : vector<8x1x8x64xf32> to vector<64x64xf32>
    %cst = arith.constant dense<0.000000e+00> : vector<64xf32>
    %4 = vector.multi_reduction <add>, %1, %cst [1] : vector<64x64xf32> to vector<64xf32>
    %5 = vector.shape_cast %4 : vector<64xf32> to vector<64x1xf32>
    %cst_7 = arith.constant dense<0.000000e+00> : vector<64xf32>
    %6 = vector.multi_reduction <add>, %3, %cst_7 [1] : vector<64x64xf32> to vector<64xf32>
    %7 = vector.shape_cast %6 : vector<64xf32> to vector<64x1xf32>
    %8 = arith.addf %5, %7 : vector<64x1xf32>
    %9 = arith.mulf %1, %1 : vector<64x64xf32>
    %cst_8 = arith.constant dense<0.000000e+00> : vector<64xf32>
    %10 = vector.multi_reduction <add>, %9, %cst_8 [1] : vector<64x64xf32> to vector<64xf32>
    %11 = vector.shape_cast %10 : vector<64xf32> to vector<64x1xf32>
    %12 = arith.mulf %3, %3 : vector<64x64xf32>
    %cst_9 = arith.constant dense<0.000000e+00> : vector<64xf32>
    %13 = vector.multi_reduction <add>, %12, %cst_9 [1] : vector<64x64xf32> to vector<64xf32>
    %14 = vector.shape_cast %13 : vector<64xf32> to vector<64x1xf32>
    %15 = arith.addf %11, %14 : vector<64x1xf32>
    %cst_10 = arith.constant 7.812500e-03 : f32
    %16 = vector.broadcast %cst_10 : f32 to vector<64x1xf32>
    %17 = arith.mulf %8, %16 : vector<64x1xf32>
    %cst_11 = arith.constant 7.812500e-03 : f32
    %18 = vector.broadcast %cst_11 : f32 to vector<64x1xf32>
    %19 = arith.mulf %15, %18 : vector<64x1xf32>
    %20 = arith.mulf %17, %17 : vector<64x1xf32>
    %21 = arith.subf %19, %20 : vector<64x1xf32>
    %cst_12 = arith.constant 9.99999974E-6 : f32
    %22 = vector.broadcast %cst_12 : f32 to vector<64x1xf32>
    %23 = arith.addf %21, %22 : vector<64x1xf32>
    %24 = math.rsqrt %23 : vector<64x1xf32>
    %25 = vector.broadcast %17 : vector<64x1xf32> to vector<64x64xf32>
    %26 = arith.subf %1, %25 : vector<64x64xf32>
    %27 = vector.broadcast %24 : vector<64x1xf32> to vector<64x64xf32>
    %28 = arith.mulf %26, %27 : vector<64x64xf32>
    %29 = vector.broadcast %17 : vector<64x1xf32> to vector<64x64xf32>
    %30 = arith.subf %3, %29 : vector<64x64xf32>
    %31 = vector.broadcast %24 : vector<64x1xf32> to vector<64x64xf32>
    %32 = arith.mulf %30, %31 : vector<64x64xf32>
    %c0_13 = arith.constant 0 : index
    %c0_14 = arith.constant 0 : index
    %33 = vector.load %arg3[%c0_13, %c0_14] : memref<64x128xf32, #tpu.memory_space<vmem>>, vector<64x128xf32>
    %cst_15 = arith.constant dense<0.000000e+00> : vector<64x128xf32>
    %34 = tpu.matmul %28, %33, %cst_15 {dimension_numbers = #tpu.dot_dimension_numbers<[1], [0], [0], [1], [0, 0, 1, 1], [], []>} : vector<64x64xf32>, vector<64x128xf32>, vector<64x128xf32> -> vector<64x128xf32>
    %c0_16 = arith.constant 0 : index
    %c0_17 = arith.constant 0 : index
    %35 = vector.load %arg4[%c0_16, %c0_17] : memref<64x128xf32, #tpu.memory_space<vmem>>, vector<64x128xf32>
    %cst_18 = arith.constant dense<0.000000e+00> : vector<64x128xf32>
    %36 = tpu.matmul %32, %35, %cst_18 {dimension_numbers = #tpu.dot_dimension_numbers<[1], [0], [0], [1], [0, 0, 1, 1], [], []>} : vector<64x64xf32>, vector<64x128xf32>, vector<64x128xf32> -> vector<64x128xf32>
    %37 = arith.addf %34, %36 : vector<64x128xf32>
    %c0_19 = arith.constant 0 : index
    %c0_20 = arith.constant 0 : index
    %38 = vector.load %arg5[%c0_19, %c0_20] : memref<1x128xf32, #tpu.memory_space<vmem>>, vector<1x128xf32>
    %39 = vector.broadcast %38 : vector<1x128xf32> to vector<64x128xf32>
    %40 = arith.addf %37, %39 : vector<64x128xf32>
    %c0_21 = arith.constant 0 : index
    %c0_22 = arith.constant 0 : index
    %41 = vector.load %arg6[%c0_21, %c0_22] : memref<64x128xf32, #tpu.memory_space<vmem>>, vector<64x128xf32>
    tpu.vector_store %arg6[%c0_21, %c0_22], %40 {strides = array<i32>} : memref<64x128xf32, #tpu.memory_space<vmem>>, vector<64x128xf32>,
    return
  }
  func.func @transform_0(%arg0: i32) -> (i32, i32, i32, i32) {
    %c0_i32 = arith.constant 0 : i32
    %c0_i32_0 = arith.constant 0 : i32
    %c0_i32_1 = arith.constant 0 : i32
    %c0_i32_2 = arith.constant 0 : i32
    return %arg0, %c0_i32, %c0_i32_0, %c0_i32_1 : i32, i32, i32, i32
  }
  func.func @transform_1(%arg0: i32) -> (i32, i32, i32, i32) {
    %c1_i32 = arith.constant 1 : i32
    %c0_i32 = arith.constant 0 : i32
    %c0_i32_0 = arith.constant 0 : i32
    %c0_i32_1 = arith.constant 0 : i32
    return %arg0, %c1_i32, %c0_i32, %c0_i32_0 : i32, i32, i32, i32
  }
  func.func @transform_2(%arg0: i32) -> (i32, i32) {
    %c0_i32 = arith.constant 0 : i32
    %c0_i32_0 = arith.constant 0 : i32
    %c0_i32_1 = arith.constant 0 : i32
    return %c0_i32, %c0_i32_0 : i32, i32
  }
  func.func @transform_3(%arg0: i32) -> (i32, i32) {
    %c0_i32 = arith.constant 0 : i32
    %c0_i32_0 = arith.constant 0 : i32
    %c0_i32_1 = arith.constant 0 : i32
    return %c0_i32, %c0_i32_0 : i32, i32
  }
  func.func @transform_4(%arg0: i32) -> (i32, i32) {
    %c0_i32 = arith.constant 0 : i32
    %c0_i32_0 = arith.constant 0 : i32
    %c0_i32_1 = arith.constant 0 : i32
    return %c0_i32, %c0_i32_0 : i32, i32
  }
  func.func @transform_5(%arg0: i32) -> (i32, i32) {
    %c0_i32 = arith.constant 0 : i32
    %c0_i32_0 = arith.constant 0 : i32
    return %arg0, %c0_i32 : i32, i32
  }
}

</mosaic_0001>

<bundles_post_ra>
// kernel: patch_merging_forward.1
= control target key start
LH: loop header
LB: loop body
LE: loop exit
PB: predicated region body
PF: predicated region fallthrough
CT: control target
= control target key end

     0   :  { %10 = vsyncpa [#allocation5], 0  ;;  %s1685_s0 = inlined_call_operand.vmem [shape: f32[16,2,8,64], index: 0, kind: input, shape index: {}, may-alias: {0,1}]   ;;  %s1686_s1 = inlined_call_operand.vmem [shape: f32[16,2,8,64], index: 1, kind: input, shape index: {}, may-alias: {0,1}]   ;;  %s1687_s2 = inlined_call_operand.vmem [shape: f32[64,128], index: 2, kind: input, shape index: {}]   ;;  %s1688_s3 = inlined_call_operand.vmem [shape: f32[64,128], index: 3, kind: input, shape index: {}]   ;;  %s1689_s4 = inlined_call_operand.vmem [shape: f32[1,128], index: 4, kind: input, shape index: {}]   ;;  %s1690_s5 = inlined_call_operand.hbm [shape: f32[128,128], index: 5, kind: output, shape index: {}]  }
   0x1   :  { %12 = vsyncpa [#allocation5 + $0x1], 0  ;;  %s1329_s18 = smov 0   ;;  %s1331_s19 = smov 0  }
   0x2   :  { %s1333_s20 = smov 0   ;;  %s1335_s21 = smov 0  }
   0x3 LB: > { %s998_s22 = sadd.s32 4294967295, %s1294_s21   ;;  %s999_s23 = sadd.s32 4294967294, %s1294_s21   ;;  %s1294_s21 = sphi %s1335_s21, %s1697_s21   ;;  %s1290_s20 = sphi %s1333_s20, %s1696_s20   ;;  %s1286_s19 = sphi %s1331_s19, %s1695_s19   ;;  %s1282_s18 = sphi %s1329_s18, %s1694_s18  }
   0x4   : > { %s1352_s24 = sadd.s32 1, %s1294_s21   ;;  %s25_s25 = sadd.s32 1, %s1290_s20 }
   0x5   : > { %s22_s26 = ssub.s32 %s1294_s21, %s1352_s24  ;;  %p32_p0 = scmp.ne.s32.totalorder %s1290_s20, %s1286_s19 }
   0x6   : > { %p23_p1 = scmp.eq.s32.totalorder %s22_s26, 0  ;;  %p33_p2 = scmp.eq.s32.totalorder %s1294_s21, 0 }
   0x7   : > { %p151_p3 = scmp.eq.s32.totalorder %s998_s22, 1  ;;  %p156_p4 = scmp.ne.s32.totalorder %s1286_s19, %s1282_s18 }
   0x8   : > { %s1365_s27 = scalar_select %p23_p1, %s1290_s20, %s25_s25  }
   0x9   : > { %p1367_p5 = por %p33_p2, %p32_p0  ;;  %p1371_p6 = por %p151_p3, %p32_p0 }
   0xa   : > { %p157_p7 = scmp.eq.s32.totalorder %s999_s23, 1  ;;  %p1001_p9 = scmp.ge.s32.totalorder %s1294_s21, 2 }
   0xc   : > { %p1375_p8 = por %p157_p7, %p156_p4  ;;  %182 = sbr.rel (%p1001_p9) target bundleno = 35 (0x23), region = 28 }
  0x13   : > { %185 = sbr.rel (!%p1367_p5) target bundleno = 27 (0x1b), region = 32  ;;  %s187_s6 = sand.u32 (%p1367_p5), 1, %s1290_s20  }
  0x14   : > { %s1044_s7 = sshll.u32 (%p1367_p5), %s1294_s21, 7  ;;  %s1002_s8 = sshll.u32 (%p1367_p5), %s187_s6, 6 }
  0x15   : > { %s193_s11 = scalar_lea.vmem (%p1367_p5), %s1685_s0, %s1044_s7  ;;  %s189_s12 = scalar_lea.vmem (%p1367_p5), [#allocation2], %s1002_s8 }
  0x16   : > { %v235_v0 = vld [vmem:[%s193_s11] sm:$0xff] (%p1367_p5)  ;;  %v237_v1 = vld [vmem:[%s193_s11 + $0x10] sm:$0xff] (%p1367_p5) }
  0x17   : > { %v239_v2 = vld [vmem:[%s193_s11 + $0x20] sm:$0xff] (%p1367_p5)  ;;  %236 = vst [vmem:[%s189_s12] sm:$0xff] (%p1367_p5), %v235_v0  ;;  %238 = vst [vmem:[%s189_s12 + $0x8] sm:$0xff] (%p1367_p5), %v237_v1  ;;  %v241_v3 = vld [vmem:[%s193_s11 + $0x30] sm:$0xff] (%p1367_p5) }
  0x18   : > { %240 = vst [vmem:[%s189_s12 + $0x10] sm:$0xff] (%p1367_p5), %v239_v2  ;;  %v243_v4 = vld [vmem:[%s193_s11 + $0x40] sm:$0xff] (%p1367_p5)  ;;  %v245_v5 = vld [vmem:[%s193_s11 + $0x50] sm:$0xff] (%p1367_p5)  ;;  %242 = vst [vmem:[%s189_s12 + $0x18] sm:$0xff] (%p1367_p5), %v241_v3 }
  0x19   : > { %244 = vst [vmem:[%s189_s12 + $0x20] sm:$0xff] (%p1367_p5), %v243_v4  ;;  %246 = vst [vmem:[%s189_s12 + $0x28] sm:$0xff] (%p1367_p5), %v245_v5  ;;  %v247_v6 = vld [vmem:[%s193_s11 + $0x60] sm:$0xff] (%p1367_p5)  ;;  %v249_v7 = vld [vmem:[%s193_s11 + $0x70] sm:$0xff] (%p1367_p5) }
  0x1a   : > { %248 = vst [vmem:[%s189_s12 + $0x30] sm:$0xff] %v247_v6  ;;  %250 = vst [vmem:[%s189_s12 + $0x38] sm:$0xff] %v249_v7 }
  0x1b PF: > { %256 = sbr.rel (!%p1367_p5) target bundleno = 35 (0x23), region = 70  ;;  %s258_s13 = sand.u32 (%p1367_p5), 1, %s1290_s20  }
  0x1c   : > { %s1045_s14 = sshll.u32 (%p1367_p5), %s1294_s21, 7  ;;  %s1006_s15 = sshll.u32 (%p1367_p5), %s258_s13, 6 }
  0x1d   : > { %s943_s23 = scalar_lea.vmem (%p1367_p5), %s1686_s1, %s1045_s14  ;;  %s260_s25 = scalar_lea.vmem (%p1367_p5), [#allocation3], %s1006_s15 }
  0x1e   : > { %v1009_v8 = vld [vmem:[%s943_s23 + $0x8] sm:$0xff] (%p1367_p5)  ;;  %v1010_v9 = vld [vmem:[%s943_s23 + $0x18] sm:$0xff] (%p1367_p5) }
  0x1f   : > { %v1011_v10 = vld [vmem:[%s943_s23 + $0x28] sm:$0xff] (%p1367_p5)  ;;  %308 = vst [vmem:[%s260_s25] sm:$0xff] (%p1367_p5), %v1009_v8  ;;  %310 = vst [vmem:[%s260_s25 + $0x8] sm:$0xff] (%p1367_p5), %v1010_v9  ;;  %v1012_v11 = vld [vmem:[%s943_s23 + $0x38] sm:$0xff] (%p1367_p5) }
  0x20   : > { %312 = vst [vmem:[%s260_s25 + $0x10] sm:$0xff] (%p1367_p5), %v1011_v10  ;;  %v1013_v12 = vld [vmem:[%s943_s23 + $0x48] sm:$0xff] (%p1367_p5)  ;;  %v1014_v13 = vld [vmem:[%s943_s23 + $0x58] sm:$0xff] (%p1367_p5)  ;;  %314 = vst [vmem:[%s260_s25 + $0x18] sm:$0xff] (%p1367_p5), %v1012_v11 }
  0x21   : > { %316 = vst [vmem:[%s260_s25 + $0x20] sm:$0xff] (%p1367_p5), %v1013_v12  ;;  %318 = vst [vmem:[%s260_s25 + $0x28] sm:$0xff] (%p1367_p5), %v1014_v13  ;;  %v1015_v14 = vld [vmem:[%s943_s23 + $0x68] sm:$0xff] (%p1367_p5)  ;;  %v1016_v15 = vld [vmem:[%s943_s23 + $0x78] sm:$0xff] (%p1367_p5) }
  0x22   : > { %320 = vst [vmem:[%s260_s25 + $0x30] sm:$0xff] %v1015_v14  ;;  %322 = vst [vmem:[%s260_s25 + $0x38] sm:$0xff] %v1016_v15 }
  0x23 PF: > { %p1017_p10 = scmp.ge.s32.totalorder %s1294_s21, 1  ;;  %p327_p11 = scmp.lt.s32.totalorder %s1294_s21, 3 }
  0x25   : > { %p328_p12 = pnand %p1017_p10, %p327_p11 }
  0x26   : > { %s334_s26 = sand.u32 (!%p328_p12), 1, %s1286_s19   ;;  %vm391_vm0 = vcmask (!%p328_p12), 523264   ;;  %v608_v52 = vld [vmem:[%s1688_s3] sm:$0xff] (!%p328_p12)  ;;  %v609_v53 = vld [vmem:[%s1688_s3 + $0x8] sm:$0xff] (!%p328_p12)  ;;  %v610_v0 = vld [vmem:[%s1688_s3 + $0x10] sm:$0xff] (!%p328_p12)  ;;  %s1296_s10 = smov (!%p328_p12), [#allocation4]  }
  0x27   : > { %331 = sbr.rel (%p328_p12) target bundleno = 498 (0x1f2), region = 108  ;;  %s1401_s28 = sshll.u32 (!%p328_p12), %s334_s26, 6  ;;  %v600_v54 = vld [vmem:[%s1687_s2] sm:$0xff] (!%p328_p12)  ;;  %v1135_v57 = vpack.c.bf16 (!%p328_p12), %v609_v53, %v608_v52  ;;  %v601_v58 = vld [vmem:[%s1687_s2 + $0x8] sm:$0xff] (!%p328_p12)  ;;  %v611_v1 = vld [vmem:[%s1688_s3 + $0x18] sm:$0xff] (!%p328_p12) }
  0x28   : > { %s1404_s6 = scalar_lea.vmem (!%p328_p12), [#allocation2], %s1401_s28  ;;  %s1417_s7 = scalar_lea.vmem (!%p328_p12), [#allocation3], %s1401_s28  ;;  %v1151_v59 = vpack.c.bf16 (!%p328_p12), %v601_v58, %v600_v54  ;;  %v602_v2 = vld [vmem:[%s1687_s2 + $0x10] sm:$0xff] (!%p328_p12)  ;;  %v1139_v3 = vpack.c.bf16 (!%p328_p12), %v611_v1, %v610_v0  ;;  %v603_v4 = vld [vmem:[%s1687_s2 + $0x18] sm:$0xff] (!%p328_p12)  ;;  %v612_v10 = vld [vmem:[%s1688_s3 + $0x20] sm:$0xff] (!%p328_p12) }
  0x29   : > { %v1407_v16 = vld [vmem:[%s1404_s6 + $0x8] sm:$0xff] (!%p328_p12)  ;;  %v1410_v17 = vld [vmem:[%s1404_s6] sm:$0xff] (!%p328_p12)  ;;  %v1442_v32 = vld [vmem:[%s1417_s7 + $0x10] sm:$0xff] (!%p328_p12)  ;;  %1136 = vmatprep.subr.bf16.mxu1 (!%p328_p12), %v1135_v57  ;;  %v1155_v5 = vpack.c.bf16 (!%p328_p12), %v603_v4, %v602_v2  ;;  %s1621_s16 = scalar_lea.vmem (!%p328_p12), [#allocation4], %s1401_s28  ;;  %s1046_s28 = sshll.u32 (!%p328_p12), %s998_s22, 10 }
  0x2a   : > { %v395_v18 = vsel (!%p328_p12), %vm391_vm0, %v1407_v16, 0.0  ;;  %v392_v19 = vsel (!%p328_p12), %vm391_vm0, %v1410_v17, 0.0  ;;  %v1420_v20 = vld [vmem:[%s1417_s7 + $0x8] sm:$0xff] (!%p328_p12)  ;;  %v1423_v21 = vld [vmem:[%s1417_s7] sm:$0xff] (!%p328_p12)  ;;  %v448_v25 = vmul.f32 (!%p328_p12), %v1410_v17, %v1410_v17  ;;  %v449_v29 = vmul.f32 (!%p328_p12), %v1407_v16, %v1407_v16  ;;  %v1445_v33 = vld [vmem:[%s1404_s6 + $0x10] sm:$0xff] (!%p328_p12)  ;;  %1152 = vmatprep.subr.bf16.mxu0 (!%p328_p12), %v1151_v59  ;;  %1138 = vmatpush3.bf16.msra.mxu1 (!%p328_p12), %v1135_v57  ;;  %s911_s17 = sshll.u32 (!%p328_p12), %s1621_s16, 4  ;;  %s1635_s8 = scalar_lea.hbm (!%p328_p12), %s1690_s5, %s1046_s28  ;;  %s1637_s17 = int_to_ptr.vmem [resolvable:$true] %s911_s17 }
  0x2b   : > { %396 = vadd.xlane.f32.xlu1 (!%p328_p12), %v395_v18  ;;  %393 = vadd.xlane.f32.xlu0 (!%p328_p12), %v392_v19  ;;  %v419_v22 = vsel (!%p328_p12), %vm391_vm0, %v1420_v20, 0.0  ;;  %v416_v23 = vsel (!%p328_p12), %vm391_vm0, %v1423_v21, 0.0  ;;  %v480_v24 = vmul.f32 (!%p328_p12), %v1423_v21, %v1423_v21  ;;  %v481_v28 = vmul.f32 (!%p328_p12), %v1420_v20, %v1420_v20  ;;  %v1452_v36 = vld [vmem:[%s1417_s7 + $0x18] sm:$0xff] (!%p328_p12)  ;;  %v1474_v48 = vld [vmem:[%s1417_s7 + $0x20] sm:$0xff] (!%p328_p12)  ;;  %v1493_v55 = vld [vmem:[%s1417_s7 + $0x28] sm:$0xff] (!%p328_p12)  ;;  %s1643_s22 = scalar_lea.sflag (!%p328_p12), [#allocation5], %s334_s26 }
  0x2c   : > { %v456_v27 = vsel (!%p328_p12), %vm391_vm0, %v448_v25, 0.0  ;;  %v459_v31 = vsel (!%p328_p12), %vm391_vm0, %v449_v29, 0.0  ;;  %v422_v34 = vsel (!%p328_p12), %vm391_vm0, %v1442_v32, 0.0  ;;  %v398_v35 = vsel (!%p328_p12), %vm391_vm0, %v1445_v33, 0.0  ;;  %v1455_v37 = vld [vmem:[%s1404_s6 + $0x18] sm:$0xff] (!%p328_p12)  ;;  %v1477_v49 = vld [vmem:[%s1404_s6 + $0x20] sm:$0xff] (!%p328_p12)  ;;  %1154 = vmatpush3.bf16.msra.mxu0 (!%p328_p12), %v1151_v59  ;;  %1140 = vmatprep.subr.bf16.mxu1 (!%p328_p12), %v1139_v3 }
  0x2d   : > { %v488_v26 = vsel (!%p328_p12), %vm391_vm0, %v480_v24, 0.0  ;;  %v491_v30 = vsel (!%p328_p12), %vm391_vm0, %v481_v28, 0.0  ;;  %v425_v38 = vsel (!%p328_p12), %vm391_vm0, %v1452_v36, 0.0  ;;  %v401_v39 = vsel (!%p328_p12), %vm391_vm0, %v1455_v37, 0.0  ;;  %v1496_v56 = vld [vmem:[%s1404_s6 + $0x28] sm:$0xff] (!%p328_p12)  ;;  %1156 = vmatprep.subr.bf16.mxu0 (!%p328_p12), %v1155_v5  ;;  %v604_v12 = vld [vmem:[%s1687_s2 + $0x20] sm:$0xff] (!%p328_p12) }
  0x2e   : > { %v482_v40 = vmul.f32 %v1442_v32, %v1442_v32  ;;  %v450_v41 = vmul.f32 %v1445_v33, %v1445_v33  ;;  %v483_v44 = vmul.f32 %v1452_v36, %v1452_v36  ;;  %v451_v45 = vmul.f32 %v1455_v37, %v1455_v37  ;;  %v613_v11 = vld [vmem:[%s1688_s3 + $0x28] sm:$0xff]  ;;  %1142 = vmatpush3.bf16.msra.mxu1 %v1139_v3  ;;  %v606_v24 = vld [vmem:[%s1687_s2 + $0x30] sm:$0xff]  ;;  %v607_v28 = vld [vmem:[%s1687_s2 + $0x38] sm:$0xff]  ;;  %s1232_s9 = scalar_lea.vmem %s1637_s17, 1024  ;;  %s1236_s11 = sshll.u32 %s1296_s10, 4  ;;  %s1237_s11 = int_to_ptr.vmem [resolvable:$false] %s1236_s11 }
  0x2f   : > { %420 = vadd.xlane.f32.xlu1 %v419_v22  ;;  %417 = vadd.xlane.f32.xlu0 %v416_v23  ;;  %v428_v50 = vsel %vm391_vm0, %v1474_v48, 0.0  ;;  %v404_v51 = vsel %vm391_vm0, %v1477_v49, 0.0  ;;  %v431_v60 = vsel %vm391_vm0, %v1493_v55, 0.0  ;;  %v407_v61 = vsel %vm391_vm0, %v1496_v56, 0.0  ;;  %v605_v14 = vld [vmem:[%s1687_s2 + $0x28] sm:$0xff]  ;;  %v614_v22 = vld [vmem:[%s1688_s3 + $0x30] sm:$0xff]  ;;  %p1233_p13 = scmp.ne.s32.totalorder %s1637_s17, %s1232_s9  ;;  %p1239_p2 = scmp.lt.s32.totalorder %s1637_s17, %s1237_s11 }
  0x30   : > { %v494_v42 = vsel %vm391_vm0, %v482_v40, 0.0  ;;  %v462_v43 = vsel %vm391_vm0, %v450_v41, 0.0  ;;  %v497_v46 = vsel %vm391_vm0, %v483_v44, 0.0  ;;  %v465_v47 = vsel %vm391_vm0, %v451_v45, 0.0  ;;  %1158 = vmatpush3.bf16.msra.mxu0 %v1155_v5  ;;  %v615_v23 = vld [vmem:[%s1688_s3 + $0x38] sm:$0xff]  ;;  %v1551_v25 = vld [vmem:[%s1417_s7 + $0x30] sm:$0xff] }
  0x31   : > { %v484_v62 = vmul.f32 %v1474_v48, %v1474_v48  ;;  %v452_v63 = vmul.f32 %v1477_v49, %v1477_v49  ;;  %v485_v8 = vmul.f32 %v1493_v55, %v1493_v55  ;;  %v453_v9 = vmul.f32 %v1496_v56, %v1496_v56  ;;  %p1234_p0 = pnand %p1233_p13, %p1371_p6  ;;  %s1238_s12 = scalar_lea.vmem %s1237_s11, 2048 }
  0x32   : > { %v1143_v13 = vpack.c.bf16 %v613_v11, %v612_v10  ;;  %v1159_v15 = vpack.c.bf16 %v605_v14, %v604_v12  ;;  %v1163_v29 = vpack.c.bf16 %v607_v28, %v606_v24  ;;  %v486_v40 = vmul.f32 %v1551_v25, %v1551_v25  ;;  %p1240_p3 = scmp.lt.s32.totalorder %s1238_s12, %s1232_s9 }
  0x33   : > { %489 = vadd.xlane.f32.xlu1 %v488_v26  ;;  %457 = vadd.xlane.f32.xlu0 %v456_v27  ;;  %v500_v6 = vsel %vm391_vm0, %v484_v62, 0.0  ;;  %v468_v7 = vsel %vm391_vm0, %v452_v63, 0.0  ;;  %v503_v18 = vsel %vm391_vm0, %v485_v8, 0.0  ;;  %v471_v19 = vsel %vm391_vm0, %v453_v9, 0.0  ;;  %v1554_v26 = vld [vmem:[%s1404_s6 + $0x30] sm:$0xff]  ;;  %p1235_p1 = pneg %p1234_p0 }
  0x34   : > { %1144 = vmatprep.subr.bf16.mxu1 %v1143_v13  ;;  %1160 = vmatprep.subr.bf16.mxu0 %v1159_v15  ;;  %v1147_v27 = vpack.c.bf16 %v615_v23, %v614_v22  ;;  %v454_v41 = vmul.f32 %v1554_v26, %v1554_v26  ;;  %p1241_p4 = por %p1240_p3, %p1239_p2 }
  0x35   : > { %1146 = vmatpush3.bf16.msra.mxu1 %v1143_v13  ;;  %1162 = vmatpush3.bf16.msra.mxu0 %v1159_v15 }
  0x36   : > { %1148 = vmatprep.subr.bf16.mxu1 %v1147_v27  ;;  %1164 = vmatprep.subr.bf16.mxu0 %v1163_v29  ;;  %p1242_p5 = pnand %p1241_p4, %p1235_p1 }
  0x37   : > { %492 = vadd.xlane.f32.xlu1 %v491_v30  ;;  %460 = vadd.xlane.f32.xlu0 %v459_v31  ;;  %v434_v30 = vsel %vm391_vm0, %v1551_v25, 0.0  ;;  %v410_v31 = vsel %vm391_vm0, %v1554_v26, 0.0 }
  0x39   : > { %1150 = vmatpush3.bf16.msra.mxu1 %v1147_v27  ;;  %1166 = vmatpush3.bf16.msra.mxu0 %v1163_v29 }
  0x3b   : > { %423 = vadd.xlane.f32.xlu1 %v422_v34  ;;  %399 = vadd.xlane.f32.xlu0 %v398_v35  ;;  %v1564_v34 = vld [vmem:[%s1417_s7 + $0x38] sm:$0xff] }
  0x3c   : > { %v1567_v35 = vld [vmem:[%s1404_s6 + $0x38] sm:$0xff]  ;;  %v487_v44 = vmul.f32 %v1564_v34, %v1564_v34 }
  0x3d   : > { %v455_v45 = vmul.f32 %v1567_v35, %v1567_v35 }
  0x3f   : > { %426 = vadd.xlane.f32.xlu1 %v425_v38  ;;  %402 = vadd.xlane.f32.xlu0 %v401_v39  ;;  %v437_v38 = vsel %vm391_vm0, %v1564_v34, 0.0  ;;  %v413_v39 = vsel %vm391_vm0, %v1567_v35, 0.0 }
  0x43   : > { %495 = vadd.xlane.f32.xlu1 %v494_v42  ;;  %463 = vadd.xlane.f32.xlu0 %v462_v43  ;;  %v506_v42 = vsel %vm391_vm0, %v486_v40, 0.0  ;;  %v474_v43 = vsel %vm391_vm0, %v454_v41, 0.0 }
  0x47   : > { %498 = vadd.xlane.f32.xlu1 %v497_v46  ;;  %466 = vadd.xlane.f32.xlu0 %v465_v47  ;;  %v509_v46 = vsel %vm391_vm0, %v487_v44, 0.0  ;;  %v477_v47 = vsel %vm391_vm0, %v455_v45, 0.0 }
  0x4b   : > { %429 = vadd.xlane.f32.xlu1 %v428_v50  ;;  %405 = vadd.xlane.f32.xlu0 %v404_v51 }
  0x4f   : > { %432 = vadd.xlane.f32.xlu1 %v431_v60  ;;  %408 = vadd.xlane.f32.xlu0 %v407_v61 }
  0x53   : > { %501 = vadd.xlane.f32.xlu1 %v500_v6  ;;  %469 = vadd.xlane.f32.xlu0 %v468_v7 }
  0x57   : > { %504 = vadd.xlane.f32.xlu1 %v503_v18  ;;  %472 = vadd.xlane.f32.xlu0 %v471_v19 }
  0x5b   : > { %435 = vadd.xlane.f32.xlu1 %v434_v30  ;;  %411 = vadd.xlane.f32.xlu0 %v410_v31 }
  0x5f   : > { %438 = vadd.xlane.f32.xlu1 %v437_v38  ;;  %414 = vadd.xlane.f32.xlu0 %v413_v39 }
  0x63   : > { %507 = vadd.xlane.f32.xlu1 %v506_v42  ;;  %475 = vadd.xlane.f32.xlu0 %v474_v43 }
  0x67   : > { %510 = vadd.xlane.f32.xlu1 %v509_v46  ;;  %478 = vadd.xlane.f32.xlu0 %v477_v47 }
  0xb8   : > { %v397_v50 = vpop.xlane.xlu1 %396  ;;  %v394_v51 = vpop.xlane.xlu0 %393 }
  0xbc   : > { %v421_v52 = vpop.xlane.xlu1 %420  ;;  %v418_v53 = vpop.xlane.xlu0 %417 }
  0xbd   : > { %v440_v54 = vadd.f32 %v418_v53, %v394_v51  ;;  %v441_v57 = vadd.f32 %v421_v52, %v397_v50 }
  0xbf   : > { %v520_v58 = vmul.f32 0.0078125, %v440_v54  ;;  %v521_v62 = vmul.f32 0.0078125, %v441_v57 }
  0xc0   : > { %v490_v59 = vpop.xlane.xlu1 %489  ;;  %v458_v60 = vpop.xlane.xlu0 %457 }
  0xc1   : > { %v512_v61 = vadd.f32 %v490_v59, %v458_v60  ;;  %v536_v63 = vmul.f32 %v520_v58, %v520_v58  ;;  %v537_v6 = vmul.f32 %v521_v62, %v521_v62  ;;  %v584_v24 = vsub.f32 %v1423_v21, %v520_v58 }
  0xc2   : > { %v568_v27 = vsub.f32 %v1410_v17, %v520_v58  ;;  %v569_v44 = vsub.f32 %v1407_v16, %v521_v62  ;;  %v585_v45 = vsub.f32 %v1420_v20, %v521_v62 }
  0xc3   : > { %v528_v0 = vmul.f32 0.0078125, %v512_v61 }
  0xc4   : > { %v493_v1 = vpop.xlane.xlu1 %492  ;;  %v461_v2 = vpop.xlane.xlu0 %460 }
  0xc5   : > { %v544_v3 = vsub.f32 %v528_v0, %v536_v63  ;;  %v513_v4 = vadd.f32 %v493_v1, %v461_v2 }
  0xc7   : > { %v552_v5 = vadd.f32 1e-05, %v544_v3  ;;  %v529_v7 = vmul.f32 0.0078125, %v513_v4 }
  0xc8   : > { %v424_v8 = vpop.xlane.xlu1 %423  ;;  %v400_v9 = vpop.xlane.xlu0 %399 }
  0xc9   : > { %1216 = vrsqrt.f32 %v552_v5  ;;  %v545_v10 = vsub.f32 %v529_v7, %v537_v6  ;;  %v442_v12 = vadd.f32 %v424_v8, %v400_v9 }
  0xcb   : > { %v553_v11 = vadd.f32 1e-05, %v545_v10  ;;  %v522_v15 = vmul.f32 0.0078125, %v442_v12 }
  0xcc   : > { %v427_v13 = vpop.xlane.xlu1 %426  ;;  %v403_v14 = vpop.xlane.xlu0 %402 }
  0xcd   : > { %1218 = vrsqrt.f32 %v553_v11  ;;  %v443_v18 = vadd.f32 %v427_v13, %v403_v14  ;;  %v538_v30 = vmul.f32 %v522_v15, %v522_v15  ;;  %v570_v0 = vsub.f32 %v1445_v33, %v522_v15 }
  0xce   : > { %v586_v1 = vsub.f32 %v1442_v32, %v522_v15 }
  0xcf   : > { %v523_v29 = vmul.f32 0.0078125, %v443_v18 }
  0xd0   : > { %v496_v19 = vpop.xlane.xlu1 %495  ;;  %v464_v22 = vpop.xlane.xlu0 %463 }
  0xd1   : > { %v514_v23 = vadd.f32 %v496_v19, %v464_v22  ;;  %v539_v46 = vmul.f32 %v523_v29, %v523_v29  ;;  %v571_v12 = vsub.f32 %v1455_v37, %v523_v29  ;;  %v587_v13 = vsub.f32 %v1452_v36, %v523_v29 }
  0xd3   : > { %v1217_v28 = vpop.eup %1216  ;;  %v530_v31 = vmul.f32 0.0078125, %v514_v23 }
  0xd4   : > { %v499_v38 = vpop.xlane.xlu1 %498  ;;  %v467_v39 = vpop.xlane.xlu0 %466  ;;  %v592_v40 = vmul.f32 %v1217_v28, %v584_v24  ;;  %v576_v41 = vmul.f32 %v1217_v28, %v568_v27 }
  0xd5   : > { %v546_v42 = vsub.f32 %v530_v31, %v538_v30  ;;  %v515_v43 = vadd.f32 %v499_v38, %v467_v39 }
  0xd6   : > { %1095 = vmatprep.mubr.msk.f32.mxu1 %vm391_vm0, %v592_v40  ;;  %1123 = vmatprep.mubr.msk.f32.mxu0 %vm391_vm0, %v576_v41 }
  0xd7   : > { %v1219_v21 = vpop.eup %1218  ;;  %v554_v17 = vadd.f32 1e-05, %v546_v42  ;;  %v531_v47 = vmul.f32 0.0078125, %v515_v43 }
  0xd8   : > { %v430_v50 = vpop.xlane.xlu1 %429  ;;  %v406_v51 = vpop.xlane.xlu0 %405  ;;  %v593_v52 = vmul.f32 %v1219_v21, %v585_v45  ;;  %v577_v53 = vmul.f32 %v1219_v21, %v569_v44 }
  0xd9   : > { %1220 = vrsqrt.f32 %v554_v17  ;;  %v547_v54 = vsub.f32 %v531_v47, %v539_v46  ;;  %v444_v20 = vadd.f32 %v430_v50, %v406_v51 }
  0xda   : > { %1096 = vmatmul.mubr.msk.f32.vlgmr.msra.gmra.mrb[0].mxu1 %vm391_vm0, %v593_v52  ;;  %1124 = vmatmul.mubr.msk.f32.vlgmr.msra.gmra.mrb[0].mxu0 %vm391_vm0, %v577_v53 }
  0xdb   : > { %v555_v16 = vadd.f32 1e-05, %v547_v54  ;;  %v524_v59 = vmul.f32 0.0078125, %v444_v20 }
  0xdc   : > { %v433_v57 = vpop.xlane.xlu1 %432  ;;  %v409_v58 = vpop.xlane.xlu0 %408 }
  0xdd   : > { %1222 = vrsqrt.f32 %v555_v16  ;;  %v445_v60 = vadd.f32 %v433_v57, %v409_v58  ;;  %v540_v4 = vmul.f32 %v524_v59, %v524_v59  ;;  %v572_v40 = vsub.f32 %v1477_v49, %v524_v59 }
  0xde   : > { %v588_v41 = vsub.f32 %v1474_v48, %v524_v59 }
  0xdf   : > { %v525_v3 = vmul.f32 0.0078125, %v445_v60 }
  0xe0   : > { %v502_v61 = vpop.xlane.xlu1 %501  ;;  %v470_v62 = vpop.xlane.xlu0 %469 }
  0xe1   : > { %v516_v63 = vadd.f32 %v502_v61, %v470_v62  ;;  %v541_v14 = vmul.f32 %v525_v3, %v525_v3  ;;  %v573_v52 = vsub.f32 %v1496_v56, %v525_v3  ;;  %v589_v53 = vsub.f32 %v1493_v55, %v525_v3 }
  0xe3   : > { %v1221_v2 = vpop.eup %1220  ;;  %v532_v5 = vmul.f32 0.0078125, %v516_v63 }
  0xe4   : > { %v505_v6 = vpop.xlane.xlu1 %504  ;;  %v473_v7 = vpop.xlane.xlu0 %472  ;;  %v594_v8 = vmul.f32 %v1221_v2, %v586_v1  ;;  %v578_v9 = vmul.f32 %v1221_v2, %v570_v0 }
  0xe5   : > { %v548_v10 = vsub.f32 %v532_v5, %v540_v4  ;;  %v517_v11 = vadd.f32 %v505_v6, %v473_v7 }
  0xe6   : > { %1098 = vmatprep.mubr.msk.f32.mxu1 %vm391_vm0, %v594_v8  ;;  %1126 = vmatprep.mubr.msk.f32.mxu0 %vm391_vm0, %v578_v9 }
  0xe7   : > { %v1223_v33 = vpop.eup %1222  ;;  %v556_v32 = vadd.f32 1e-05, %v548_v10  ;;  %v533_v15 = vmul.f32 0.0078125, %v517_v11 }
  0xe8   : > { %v436_v18 = vpop.xlane.xlu1 %435  ;;  %v412_v19 = vpop.xlane.xlu0 %411  ;;  %v595_v22 = vmul.f32 %v1223_v33, %v587_v13  ;;  %v579_v23 = vmul.f32 %v1223_v33, %v571_v12 }
  0xe9   : > { %1224 = vrsqrt.f32 %v556_v32  ;;  %v549_v24 = vsub.f32 %v533_v15, %v541_v14  ;;  %v446_v36 = vadd.f32 %v436_v18, %v412_v19 }
  0xea   : > { %1099 = vmatmul.mubr.msk.f32.gmra.mrb[2].mxu1 %vm391_vm0, %v595_v22  ;;  %1127 = vmatmul.mubr.msk.f32.gmra.mrb[2].mxu0 %vm391_vm0, %v579_v23 }
  0xeb   : > { %v557_v37 = vadd.f32 1e-05, %v549_v24  ;;  %v526_v29 = vmul.f32 0.0078125, %v446_v36 }
  0xec   : > { %v439_v27 = vpop.xlane.xlu1 %438  ;;  %v415_v28 = vpop.xlane.xlu0 %414 }
  0xed   : > { %1226 = vrsqrt.f32 %v557_v37  ;;  %v447_v30 = vadd.f32 %v439_v27, %v415_v28  ;;  %v542_v44 = vmul.f32 %v526_v29, %v526_v29  ;;  %v574_v55 = vsub.f32 %v1554_v26, %v526_v29 }
  0xee   : > { %v590_v56 = vsub.f32 %v1551_v25, %v526_v29 }
  0xef   : > { %v527_v43 = vmul.f32 0.0078125, %v447_v30 }
  0xf0   : > { %v508_v31 = vpop.xlane.xlu1 %507  ;;  %v476_v38 = vpop.xlane.xlu0 %475 }
  0xf1   : > { %v518_v39 = vadd.f32 %v508_v31, %v476_v38  ;;  %v543_v54 = vmul.f32 %v527_v43, %v527_v43  ;;  %v575_v63 = vsub.f32 %v1567_v35, %v527_v43  ;;  %v591_v0 = vsub.f32 %v1564_v34, %v527_v43  ;;  %v1037_v35 = vld [vmem:[%s1689_s4] ss:$0 sm:$0xff] }
  0xf3   : > { %v1225_v42 = vpop.eup %1224  ;;  %v534_v45 = vmul.f32 0.0078125, %v518_v39 }
  0xf4   : > { %v511_v21 = vpop.xlane.xlu1 %510  ;;  %v479_v17 = vpop.xlane.xlu0 %478  ;;  %v596_v46 = vmul.f32 %v1225_v42, %v588_v41  ;;  %v580_v47 = vmul.f32 %v1225_v42, %v572_v40 }
  0xf5   : > { %v550_v50 = vsub.f32 %v534_v45, %v542_v44  ;;  %v519_v51 = vadd.f32 %v511_v21, %v479_v17 }
  0xf6   : > { %1101 = vmatprep.mubr.msk.f32.mxu1 %vm391_vm0, %v596_v46  ;;  %1129 = vmatprep.mubr.msk.f32.mxu0 %vm391_vm0, %v580_v47 }
  0xf7   : > { %v1227_v49 = vpop.eup %1226  ;;  %v558_v48 = vadd.f32 1e-05, %v550_v50  ;;  %v535_v16 = vmul.f32 0.0078125, %v519_v51 }
  0xf8   : > { %v597_v20 = vmul.f32 %v1227_v49, %v589_v53  ;;  %v581_v57 = vmul.f32 %v1227_v49, %v573_v52 }
  0xf9   : > { %1228 = vrsqrt.f32 %v558_v48  ;;  %v551_v58 = vsub.f32 %v535_v16, %v543_v54 }
  0xfa   : > { %1102 = vmatmul.mubr.msk.f32.gmra.mrb[4].mxu1 %vm391_vm0, %v597_v20  ;;  %1130 = vmatmul.mubr.msk.f32.gmra.mrb[4].mxu0 %vm391_vm0, %v581_v57 }
  0xfb   : > { %v559_v59 = vadd.f32 1e-05, %v551_v58 }
  0xfd   : > { %1230 = vrsqrt.f32 %v559_v59 }
 0x103   : > { %v1229_v60 = vpop.eup %1228 }
 0x104   : > { %v598_v61 = vmul.f32 %v1229_v60, %v590_v56  ;;  %v582_v62 = vmul.f32 %v1229_v60, %v574_v55 }
 0x106   : > { %1104 = vmatprep.mubr.msk.f32.mxu1 %vm391_vm0, %v598_v61  ;;  %1132 = vmatprep.mubr.msk.f32.mxu0 %vm391_vm0, %v582_v62 }
 0x107   : > { %v1231_v1 = vpop.eup %1230 }
 0x108   : > { %v599_v2 = vmul.f32 %v1231_v1, %v591_v0  ;;  %v583_v3 = vmul.f32 %v1231_v1, %v575_v63 }
 0x10a   : > { %1105 = vmatmul.mubr.msk.f32.gmra.mrb[6].mxu1 %vm391_vm0, %v599_v2  ;;  %1133 = vmatmul.mubr.msk.f32.gmra.mrb[6].mxu0 %vm391_vm0, %v583_v3 }
 0x1ad   : > { %v1097_v25 = vpop.f32.mrb[0].mxu1  ;;  %v1125_v26 = vpop.f32.mrb[0].mxu0 }
 0x1ae   : > { %v841_v4 = vadd.f32 %v1125_v26, %v1097_v25  ;;  %v706_v34 = vpop.f32.mrb[1].mxu1  ;;  %v835_v5 = vpop.f32.mrb[1].mxu0 }
 0x1af   : > { %v836_v6 = vadd.f32 %v835_v5, %v706_v34 }
 0x1b0   : > { %v882_v7 = vadd.f32 %v1037_v35, %v841_v4 }
 0x1b1   : > { %v881_v8 = vadd.f32 %v1037_v35, %v836_v6 }
 0x1b2   : > { %890 = vst [vmem:[%s1621_s16 + $0x8] sm:$0xff] %v882_v7 }
 0x1b3   : > { %889 = vst [vmem:[%s1621_s16] sm:$0xff] %v881_v8 }
 0x1bd   : > { %v1100_v9 = vpop.f32.mrb[2].mxu1  ;;  %v1128_v10 = vpop.f32.mrb[2].mxu0 }
 0x1be   : > { %v851_v11 = vadd.f32 %v1128_v10, %v1100_v9  ;;  %v716_v12 = vpop.f32.mrb[3].mxu1  ;;  %v845_v13 = vpop.f32.mrb[3].mxu0 }
 0x1bf   : > { %v846_v33 = vadd.f32 %v845_v13, %v716_v12 }
 0x1c0   : > { %v884_v32 = vadd.f32 %v1037_v35, %v851_v11 }
 0x1c1   : > { %v883_v14 = vadd.f32 %v1037_v35, %v846_v33 }
 0x1c2   : > { %892 = vst [vmem:[%s1621_s16 + $0x18] sm:$0xff] %v884_v32 }
 0x1c3   : > { %891 = vst [vmem:[%s1621_s16 + $0x10] sm:$0xff] %v883_v14 }
 0x1cd   : > { %v1103_v15 = vpop.f32.mrb[4].mxu1  ;;  %v1131_v18 = vpop.f32.mrb[4].mxu0 }
 0x1ce   : > { %v861_v19 = vadd.f32 %v1131_v18, %v1103_v15  ;;  %v726_v22 = vpop.f32.mrb[5].mxu1  ;;  %v855_v23 = vpop.f32.mrb[5].mxu0 }
 0x1cf   : > { %v856_v24 = vadd.f32 %v855_v23, %v726_v22 }
 0x1d0   : > { %v886_v37 = vadd.f32 %v1037_v35, %v861_v19 }
 0x1d1   : > { %v885_v36 = vadd.f32 %v1037_v35, %v856_v24 }
 0x1d2   : > { %894 = vst [vmem:[%s1621_s16 + $0x28] sm:$0xff] %v886_v37 }
 0x1d3   : > { %893 = vst [vmem:[%s1621_s16 + $0x20] sm:$0xff] %v885_v36 }
 0x1dd   : > { %v1106_v27 = vpop.f32.mrb[6].mxu1  ;;  %v1134_v28 = vpop.f32.mrb[6].mxu0 }
 0x1de   : > { %v871_v29 = vadd.f32 %v1134_v28, %v1106_v27  ;;  %v736_v30 = vpop.f32.mrb[7].mxu1  ;;  %v865_v31 = vpop.f32.mrb[7].mxu0 }
 0x1df   : > { %v866_v38 = vadd.f32 %v865_v31, %v736_v30 }
 0x1e0   : > { %v888_v39 = vadd.f32 %v1037_v35, %v871_v29 }
 0x1e1   : > { %v887_v40 = vadd.f32 %v1037_v35, %v866_v38 }
 0x1e2   : > { %896 = vst [vmem:[%s1621_s16 + $0x38] sm:$0xff] %v888_v39 }
 0x1e3   : > { %895 = vst [vmem:[%s1621_s16 + $0x30] sm:$0xff] %v887_v40 }
 0x1e4   : > { %1245 = shalt.err (!%p1242_p5)
}
 0x1e5   : > { %s1246_s26 = scalar_lea.hbm %s1635_s8, 1024  ;;  %s1250_s15 = scalar_lea.hbm %s1690_s5, 2048 }
 0x1e6   : > { %p1247_p7 = scmp.ne.s32.totalorder %s1635_s8, %s1246_s26  ;;  %p1251_p12 = scmp.lt.u32.totalorder %s1635_s8, %s1690_s5 }
 0x1e7   : > { %p1252_p13 = scmp.lt.u32.totalorder %s1250_s15, %s1246_s26  ;;  %p1254_p1 = scmp.lt.u32.totalorder %s1246_s26, %s1635_s8 }
 0x1e8   : > { %p1248_p10 = pnand %p1247_p7, %p1371_p6 }
 0x1e9   : > { %p1253_p0 = por %p1252_p13, %p1251_p12 }
 0x1ea   : > { %p1249_p11 = pneg %p1248_p10 }
 0x1eb   : > { %p1255_p2 = por %p1254_p1, %p1253_p0 }
 0x1ed   : > { %p1256_p3 = pnand %p1255_p2, %p1249_p11 }
 0x1ef   : > { %1259 = shalt.err (!%p1256_p3)
}
 0x1f0   : > { %s1297_s16 = smov 128   ;;  %s1298_s28 = smov 8  }
 0x1f1   : > { %1175 = dma.vmem_to_hbm [thread:$0]  (%p1371_p6), %s1637_s17, 1024, %s1635_s8, %s1643_s22, %s1297_s16, %s1297_s16, %s1298_s28  }
 0x1f2 PF: > { %s926_s23 = sand.u32 1, %s1282_s18   ;;  %p1178_p4 = pnand %p1001_p9, %p1375_p8 }
 0x1f3   : > { %s927_s25 = scalar_lea.sflag [#allocation5], %s926_s23 }
 0x1f4   : > { %1277 = dma.done.wait (!%p1178_p4), %s927_s25, 1024  }
 0x1f5   : > { %1279 = vsyncadd (!%p1178_p4), %s927_s25, 4294966272  ;;  %p15_p5 = scmp.ge.s32.totalorder %s1352_s24, 4   ;;  %s1694_s18 = smov %s1286_s19 }
 0x1f6   : > { %s1695_s19 = smov %s1290_s20  ;;  %s1696_s20 = smov %s1365_s27 }
 0x1f7   : > { %s1697_s21 = smov %s1352_s24  ;;  %17 = sbr.rel (!%p15_p5) target bundleno = 3 (0x3), region = 164 }
 0x1fe   :  { %932 = vsyncpa [#allocation5], 1 }
 0x1ff   :  { %934 = vsyncpa [#allocation5 + $0x1], 1 }

</bundles_post_ra>
